<compile_context>
chip_gen: v7x
topology: tpu7x:2x2x1
jax: 0.10.0
libtpu: 0.0.40
codegen_flags: <defaults>
</compile_context>

<pallas_src>
import functools

import jax
import jax.numpy as jnp
import numpy as np
from jax.experimental import pallas as pl
from jax.experimental.pallas import tpu as pltpu


def _round_up(x, m):
    return (x + m - 1) // m * m


# ---------------------------------------------------------------------------
# Kernels
# ---------------------------------------------------------------------------

def _pool_reduce_kernel(x_ref, o_ref):
    """Divisible fast path.

    x_ref: (TB, n_out, w, D) VMEM tile.  The wrapper exposes the (B, L, D)
    input through a free, contiguous (B, n_out, w, D) view, so every adaptive
    window is exactly one contiguous group of `w` rows and the whole pool is a
    single sublane-axis max on the VPU.
    o_ref: (TB, n_out, D).
    """
    o_ref[...] = jnp.max(x_ref[...], axis=2).astype(o_ref.dtype)


def _pool_windows_kernel(x_ref, o_ref, *, n_groups, out_size):
    """General fallback matching PyTorch AdaptiveMaxPool1d exactly
    (possibly-overlapping windows when L is not divisible by out_size).

    x_ref: (TB, L, D);  o_ref: (TB, n_groups * out_size, D).
    Window for output i within a group of length Lg:
        start = floor(i * Lg / S), end = ceil((i + 1) * Lg / S)
    All windows are static, so this unrolls into sublane-axis max reductions.
    """
    _, L, _ = x_ref.shape
    Lg = L // n_groups
    rows = []
    for g in range(n_groups):
        base = g * Lg
        for i in range(out_size):
            start = base + (i * Lg) // out_size
            end = base + ((i + 1) * Lg + out_size - 1) // out_size  # ceil
            rows.append(jnp.max(x_ref[:, start:end, :], axis=1, keepdims=True))
    o_ref[...] = jnp.concatenate(rows, axis=1).astype(o_ref.dtype)


# ---------------------------------------------------------------------------
# Wrapper
# ---------------------------------------------------------------------------

def adaptive_max_pool1d(x, out_size, *, n_groups=1,
                        vmem_budget_bytes=8 * 1024 * 1024):
    """x: (B, L, D) -> (B, n_groups * out_size, D).

    n_groups=1:
        nn.AdaptiveMaxPool1d(out_size)(x.permute(0,2,1)).permute(0,2,1)
        (the permutes are folded into reducing over the L axis).
    n_groups=2:
        Additionally folds cat(chunk(x, 2, 1), 0) before the pool and
        cat(chunk(., 2, 0), 1) after it into the same kernel, so the
        activation tensor makes exactly one HBM round-trip.
    """
    B, L, D = x.shape
    if L % n_groups != 0:
        raise ValueError(f"L={L} must be divisible by n_groups={n_groups}")
    Lg = L // n_groups
    n_out = n_groups * out_size
    itemsize = np.dtype(x.dtype).itemsize
    divisible = (Lg % out_size == 0)

    # --- choose TB (batch rows per grid step) from a padded, double-buffered
    # VMEM budget.  Budget is conservative enough for every generation
    # (v5e 16 MiB / v6e+v7x 32 MiB scoped defaults; limit raised to 32 MiB).
    lanes = _round_up(D, 128)
    if divisible:
        w = Lg // out_size
        in_elems_per_row = n_out * _round_up(w, 8) * lanes
    else:
        w = None
        in_elems_per_row = _round_up(L, 8) * lanes
    out_elems_per_row = _round_up(n_out, 8) * lanes
    per_row_bytes = 2 * (in_elems_per_row + out_elems_per_row) * itemsize
    tb = max(1, min(B, vmem_budget_bytes // per_row_bytes))
    if B >= 2:
        # Keep >= 2 grid steps so both TensorCores get work on v7x megacore.
        tb = min(tb, pl.cdiv(B, 2))
    grid = (pl.cdiv(B, tb),)

    compiler_params = pltpu.CompilerParams(
        dimension_semantics=("parallel",),
        vmem_limit_bytes=32 * 1024 * 1024,
    )
    out_shape = jax.ShapeDtypeStruct((B, n_out, D), x.dtype)
    # Note: when D % 128 == 0 (VL-T5 hidden sizes 768/1024) this store is
    # lane-dense; for tiny D a masked store is accepted rather than forcing a
    # risky in-kernel relayout.
    out_spec = pl.BlockSpec((tb, n_out, D), lambda b: (b, 0, 0))

    if divisible:
        x4 = x.reshape(B, n_out, w, D)  # free, contiguous view in HBM
        return pl.pallas_call(
            _pool_reduce_kernel,
            out_shape=out_shape,
            grid_spec=pltpu.PrefetchScalarGridSpec(
                num_scalar_prefetch=0,
                grid=grid,
                in_specs=[pl.BlockSpec((tb, n_out, w, D),
                                       lambda b: (b, 0, 0, 0))],
                out_specs=out_spec,
            ),
            compiler_params=compiler_params,
        )(x4)

    kernel = functools.partial(_pool_windows_kernel,
                               n_groups=n_groups, out_size=out_size)
    return pl.pallas_call(
        kernel,
        out_shape=out_shape,
        grid_spec=pltpu.PrefetchScalarGridSpec(
            num_scalar_prefetch=0,
            grid=grid,
            in_specs=[pl.BlockSpec((tb, L, D), lambda b: (b, 0, 0))],
            out_specs=out_spec,
        ),
        compiler_params=compiler_params,
    )(x)


# ---------------------------------------------------------------------------
# Module
# ---------------------------------------------------------------------------

class OneDDownsample:
    """JAX/Pallas port of the PyTorch OneDDownsample module (no parameters)."""

    def __init__(self, output_size):
        self.output_size = output_size

    def downsample_inputs(self, inputs):
        # inputs: (B, L, dim) -> (B, output_size, dim)
        return adaptive_max_pool1d(inputs, self.output_size)

    @staticmethod
    def _fold_aux(x, half):
        # cat(chunk(x, 2, 1), 0) -> [:, :half] -> cat(chunk(., 2, 0), 1)
        a, b = jnp.split(x, 2, axis=1)
        x = jnp.concatenate([a, b], axis=0)
        x = x[:, :half]
        a, b = jnp.split(x, 2, axis=0)
        return jnp.concatenate([a, b], axis=1)

    def __call__(self, inputs_tuple):
        if len(inputs_tuple) == 4:
            inputs, boxes, img_order_ids, obj_order_ids = inputs_tuple
            # chunk(2,1)+cat(0) -> pool -> chunk(2,0)+cat(1), fused in-kernel.
            inputs = adaptive_max_pool1d(inputs, self.output_size, n_groups=2)
            half = inputs.shape[1] // 2  # == output_size
            boxes = self._fold_aux(boxes, half)
            img_order_ids = self._fold_aux(img_order_ids, half)
            obj_order_ids = self._fold_aux(obj_order_ids, half)
            return (inputs, boxes, img_order_ids, obj_order_ids)
        else:
            inputs, boxes = inputs_tuple
            inputs = self.downsample_inputs(inputs)
            boxes = boxes[:, : inputs.shape[1]]
            return (inputs, boxes)


# ---------------------------------------------------------------------------
# NumPy references (PyTorch semantics) & test
# ---------------------------------------------------------------------------

def _ref_adaptive_max_pool1d(x, out_size):
    x = np.asarray(x)
    B, L, D = x.shape
    out = np.empty((B, out_size, D), dtype=x.dtype)
    for i in range(out_size):
        start = (i * L) // out_size
        end = -((-(i + 1) * L) // out_size)  # ceil
        out[:, i, :] = x[:, start:end, :].max(axis=1)
    return out


def _ref_fold(x, out_size, pooled_input=False):
    x = np.asarray(x)
    a, b = np.split(x, 2, axis=1)
    x = np.concatenate([a, b], axis=0)
    if pooled_input:
        x = _ref_adaptive_max_pool1d(x, out_size)
    else:
        x = x[:, :out_size]
    a, b = np.split(x, 2, axis=0)
    return np.concatenate([a, b], axis=1)


if __name__ == "__main__":
    key = jax.random.PRNGKey(0)
    k1, k2, k3, k4, k5, k6 = jax.random.split(key, 6)

    B, L, DIM = 2, 16, 32      # small shapes; L even so chunk-by-2 works
    OUT_SIZE = 4               # adaptive-max-pool target length

    inputs = jax.random.normal(k1, (B, L, DIM), dtype=jnp.float32)
    boxes = jax.random.uniform(k2, (B, L, 4), dtype=jnp.float32)
    img_order_ids = jax.random.randint(k3, (B, L), 0, 2, dtype=jnp.int32)
    obj_order_ids = jax.random.randint(k4, (B, L), 0, L, dtype=jnp.int32)

    module = OneDDownsample(OUT_SIZE)

    # 4-tuple branch (fused chunk/cat + pool, divisible fast path).
    out_inputs, out_boxes, out_img_ids, out_obj_ids = module(
        (inputs, boxes, img_order_ids, obj_order_ids)
    )
    jax.block_until_ready((out_inputs, out_boxes, out_img_ids, out_obj_ids))

    # 2-tuple branch (plain pool, divisible fast path).
    out2_inputs, out2_boxes = module((inputs, boxes))
    jax.block_until_ready((out2_inputs, out2_boxes))

    # Correctness vs NumPy reference of the PyTorch semantics.
    np.testing.assert_allclose(
        np.asarray(out2_inputs),
        _ref_adaptive_max_pool1d(inputs, OUT_SIZE),
        rtol=1e-6, atol=1e-6)
    np.testing.assert_allclose(
        np.asarray(out_inputs),
        _ref_fold(inputs, OUT_SIZE, pooled_input=True),
        rtol=1e-6, atol=1e-6)
    np.testing.assert_allclose(
        np.asarray(out_boxes), _ref_fold(boxes, OUT_SIZE), rtol=1e-6, atol=1e-6)
    np.testing.assert_array_equal(
        np.asarray(out_img_ids), _ref_fold(img_order_ids, OUT_SIZE))
    np.testing.assert_array_equal(
        np.asarray(out_obj_ids), _ref_fold(obj_order_ids, OUT_SIZE))

    assert out_inputs.shape == (B, 2 * OUT_SIZE, DIM)
    assert out_boxes.shape == (B, 2 * OUT_SIZE, 4)
    assert out_img_ids.shape == (B, 2 * OUT_SIZE)
    assert out_obj_ids.shape == (B, 2 * OUT_SIZE)
    assert out2_inputs.shape == (B, OUT_SIZE, DIM)
    assert out2_boxes.shape == (B, OUT_SIZE, 4)

    # Non-divisible (overlapping-window) fallback path, with a partial
    # trailing batch block (B=3, TB=2 -> grid=2).
    x_nd = jax.random.normal(k5, (3, 10, DIM), dtype=jnp.float32)
    y_nd = adaptive_max_pool1d(x_nd, OUT_SIZE)
    jax.block_until_ready(y_nd)
    np.testing.assert_allclose(
        np.asarray(y_nd), _ref_adaptive_max_pool1d(x_nd, OUT_SIZE),
        rtol=1e-6, atol=1e-6)

    # Divisible path with a partial trailing batch block.
    x_dv = jax.random.normal(k6, (3, 16, DIM), dtype=jnp.float32)
    y_dv = adaptive_max_pool1d(x_dv, OUT_SIZE)
    jax.block_until_ready(y_dv)
    np.testing.assert_allclose(
        np.asarray(y_dv), _ref_adaptive_max_pool1d(x_dv, OUT_SIZE),
        rtol=1e-6, atol=1e-6)

    print("KERNEL_OK")
</pallas_src>

<mosaic_0001>
module attributes {stable_mosaic.version = 11 : i64} {
  func.func @_pool_reduce_kernel(%arg0: i32, %arg1: memref<1x8x2x32xf32, #tpu.memory_space<vmem>>, %arg2: memref<1x8x32xf32, #tpu.memory_space<vmem>>) attributes {dimension_semantics = [#tpu.dimension_semantics<parallel>], iteration_bounds = array<i64: 2>, scalar_prefetch = 0 : i64, scratch_operands = 0 : i64, tpu.core_type = #tpu.core_type<tc>, window_params = [{transform_indices = @transform_0, window_bounds = array<i64: 1, 8, 2, 32>}, {transform_indices = @transform_1, window_bounds = array<i64: 1, 8, 32>}]} {
    %c0 = arith.constant 0 : index
    %c0_0 = arith.constant 0 : index
    %c0_1 = arith.constant 0 : index
    %c0_2 = arith.constant 0 : index
    %0 = vector.load %arg1[%c0, %c0_0, %c0_1, %c0_2] : memref<1x8x2x32xf32, #tpu.memory_space<vmem>>, vector<1x8x2x32xf32>
    %cst = arith.constant dense<0xFF800000> : vector<1x8x32xf32>
    %1 = vector.multi_reduction <maximumf>, %0, %cst [2] : vector<1x8x2x32xf32> to vector<1x8x32xf32>
    %c0_3 = arith.constant 0 : index
    %c0_4 = arith.constant 0 : index
    %c0_5 = arith.constant 0 : index
    %2 = vector.load %arg2[%c0_3, %c0_4, %c0_5] : memref<1x8x32xf32, #tpu.memory_space<vmem>>, vector<1x8x32xf32>
    tpu.vector_store %arg2[%c0_3, %c0_4, %c0_5], %1 {strides = array<i32>} : memref<1x8x32xf32, #tpu.memory_space<vmem>>, vector<1x8x32xf32>,
    return
  }
  func.func @transform_0(%arg0: i32) -> (i32, i32, i32, i32) {
    %c0_i32 = arith.constant 0 : i32
    %c0_i32_0 = arith.constant 0 : i32
    %c0_i32_1 = arith.constant 0 : i32
    %c0_i32_2 = arith.constant 0 : i32
    return %arg0, %c0_i32, %c0_i32_0, %c0_i32_1 : i32, i32, i32, i32
  }
  func.func @transform_1(%arg0: i32) -> (i32, i32, i32) {
    %c0_i32 = arith.constant 0 : i32
    %c0_i32_0 = arith.constant 0 : i32
    %c0_i32_1 = arith.constant 0 : i32
    return %arg0, %c0_i32, %c0_i32_0 : i32, i32, i32
  }
}

</mosaic_0001>

<bundles_post_ra>
// kernel: tpu_custom_call.1
= control target key start
LH: loop header
LB: loop body
LE: loop exit
PB: predicated region body
PF: predicated region fallthrough
CT: control target
= control target key end

     0   :  { %6 = vsyncpa [#allocation3], 0  ;;  %s655_s0 = inlined_call_operand.hbm [shape: f32[2,8,2,32], index: 0, kind: input, shape index: {}]   ;;  %s656_s1 = inlined_call_operand.hbm [shape: f32[2,8,32], index: 1, kind: output, shape index: {}]  }
   0x1   :  { %8 = vsyncpa [#allocation3 + $0x1], 0 }
   0x2   :  { %9 = vsyncpa [#allocation4], 0 }
   0x3   :  { %11 = vsyncpa [#allocation4 + $0x1], 0  ;;  %s483_s6 = smov 0   ;;  %s485_s7 = smov 0  }
   0x4   :  { %s487_s8 = smov 0   ;;  %s489_s9 = smov 0  }
   0x5 LB: > { %s504_s10 = sadd.s32 4294967295, %s467_s9   ;;  %s309_s11 = sadd.s32 4294967294, %s467_s9   ;;  %s467_s9 = sphi %s489_s9, %s669_s9   ;;  %s463_s8 = sphi %s487_s8, %s668_s8   ;;  %s459_s7 = sphi %s485_s7, %s667_s7   ;;  %s455_s6 = sphi %s483_s6, %s666_s6  }
   0x6   : > { %s508_s12 = sadd.s32 1, %s467_s9   ;;  %s24_s13 = sadd.s32 1, %s463_s8 }
   0x7   : > { %s21_s14 = ssub.s32 %s467_s9, %s508_s12  ;;  %p31_p0 = scmp.ne.s32.totalorder %s463_s8, %s459_s7 }
   0x8   : > { %p22_p1 = scmp.eq.s32.totalorder %s21_s14, 0  ;;  %p32_p2 = scmp.eq.s32.totalorder %s467_s9, 0 }
   0x9   : > { %p37_p3 = scmp.ne.s32.totalorder %s459_s7, %s455_s6  ;;  %p38_p4 = scmp.eq.s32.totalorder %s504_s10, 0 }
   0xa   : > { %s520_s15 = scalar_select %p22_p1, %s463_s8, %s24_s13  }
   0xb   : > { %p522_p5 = por %p32_p2, %p31_p0  ;;  %p526_p6 = por %p38_p4, %p37_p3 }
   0xc   : > { %p61_p7 = scmp.eq.s32.totalorder %s504_s10, 1  ;;  %p67_p8 = scmp.eq.s32.totalorder %s309_s11, 1 }
   0xd   : > { %p335_p10 = scmp.lt.s32.totalorder %s467_s9, 2  ;;  %s87_s20 = sand.u32 1, %s463_s8  }
   0xe   : > { %p533_p11 = por %p61_p7, %p31_p0  ;;  %p537_p12 = por %p67_p8, %p37_p3 }
   0xf   : > { %s322_s21 = sshll.u32 %s467_s9, 8  ;;  %s312_s22 = sshll.u32 %s87_s20, 4 }
  0x10   : > { %s660_s18 = scalar_select %p533_p11, 1, 0 }
  0x11   : > { %s661_s19 = scalar_select %p537_p12, 1, 0 }
  0x12   : > { %s546_s25 = scalar_lea.hbm %s655_s0, %s322_s21  ;;  %s91_s26 = scalar_lea.vmem [#allocation2], %s312_s22 }
  0x13   : > { %s98_s27 = sshll.u32 %s91_s26, 4  ;;  %p550_p13 = pnand %p335_p10, %p522_p5  ;;  %s554_s27 = int_to_ptr.vmem [resolvable:$true] %s98_s27 }
  0x14   : > { %s556_s29 = scalar_lea.sflag [#allocation3], %s87_s20  ;;  %s371_s30 = scalar_lea.hbm %s546_s25, 256 }
  0x15   : > { %p372_p0 = scmp.ne.s32.totalorder %s546_s25, %s371_s30  ;;  %p373_p1 = pneg %p550_p13 }
  0x16   : > { %s376_s4 = scalar_lea.hbm %s655_s0, 512  ;;  %p377_p4 = scmp.lt.u32.totalorder %s546_s25, %s655_s0 }
  0x17   : > { %p374_p2 = pnand %p373_p1, %p372_p0  ;;  %p378_p5 = scmp.lt.u32.totalorder %s376_s4, %s371_s30 }
  0x18   : > { %p380_p8 = scmp.lt.u32.totalorder %s371_s30, %s546_s25 }
  0x19   : > { %p375_p3 = pneg %p374_p2  ;;  %p379_p7 = por %p378_p5, %p377_p4 }
  0x1b   : > { %p381_p10 = por %p380_p8, %p379_p7 }
  0x1d   : > { %p382_p9 = pnand %p381_p10, %p375_p3 }
  0x1f   : > { %385 = shalt.err (!%p382_p9)
}
  0x20   : > { %s386_s13 = scalar_lea.vmem %s554_s27, 256  ;;  %s469_s14 = smov [#allocation2]  }
  0x21   : > { %p387_p0 = scmp.ne.s32.totalorder %s554_s27, %s386_s13  ;;  %s391_s16 = sshll.u32 %s469_s14, 4  ;;  %s392_s16 = int_to_ptr.vmem [resolvable:$false] %s391_s16 }
  0x22   : > { %s393_s20 = scalar_lea.vmem %s392_s16, 512  ;;  %p394_p11 = scmp.lt.s32.totalorder %s554_s27, %s392_s16 }
  0x23   : > { %p389_p2 = pnand %p387_p0, %p373_p1  ;;  %p395_p4 = scmp.lt.s32.totalorder %s393_s20, %s386_s13 }
  0x25   : > { %p390_p12 = pneg %p389_p2  ;;  %p396_p5 = por %p395_p4, %p394_p11 }
  0x27   : > { %p397_p7 = pnand %p396_p5, %p390_p12 }
  0x29   : > { %400 = shalt.err (!%p397_p7)
}
  0x2a   : > { %s470_s21 = smov 32   ;;  %s471_s22 = smov 2  }
  0x2b   : > { %330 = dma.hbm_to_vmem [thread:$0]  (!%p550_p13), %s546_s25, 256, %s554_s27, %s556_s29, %s470_s21, %s470_s21, %s471_s22  }
  0x2c   : > { %p315_p9 = scmp.ge.s32.totalorder %s467_s9, 1  ;;  %p106_p1 = scmp.lt.s32.totalorder %s467_s9, 3 }
  0x2e   : > { %p107_p3 = pnand %p315_p9, %p106_p1 }
  0x2f   : > { %s587_s23 = sand.u32 (!%p107_p3), 1, %s459_s7  }
  0x30   : > { %110 = sbr.rel (%p107_p3) target bundleno = 93 (0x5d), region = 24  ;;  %s316_s24 = sshll.u32 (!%p107_p3), %s587_s23, 4 }
  0x31   : > { %s113_s26 = scalar_lea.sflag (!%p107_p3), [#allocation3], %s587_s23  ;;  %s116_s30 = scalar_lea.vmem (!%p107_p3), [#allocation2], %s316_s24 }
  0x37   : > { %446 = dma.done.wait (%p526_p6), %s113_s26, 256  }
  0x38   : > { %448 = vsyncadd (%p526_p6), %s113_s26, 4294967040  ;;  %vm143_vm0 = vcmask 254976   ;;  %v135_v0 = vld [vmem:[%s116_s30] sm:$0x3]  ;;  %v136_v1 = vld [vmem:[%s116_s30 + $0x2] sm:$0x3] }
  0x39   : > { %v137_v2 = vld [vmem:[%s116_s30 + $0x4] sm:$0x3]  ;;  %v138_v3 = vld [vmem:[%s116_s30 + $0x6] sm:$0x3]  ;;  %v139_v4 = vld [vmem:[%s116_s30 + $0x8] sm:$0x3] }
  0x3a   : > { %v140_v5 = vld [vmem:[%s116_s30 + $0xa] sm:$0x3]  ;;  %v141_v6 = vld [vmem:[%s116_s30 + $0xc] sm:$0x3]  ;;  %v144_v7 = vsel %vm143_vm0, %v135_v0, -inf  ;;  %v151_v8 = vsel %vm143_vm0, %v136_v1, -inf }
  0x3b   : > { %v142_v9 = vld [vmem:[%s116_s30 + $0xe] sm:$0x3]  ;;  %v145_v10 = vrot.slane %v144_v7, 4  ;;  %v152_v11 = vrot.slane %v151_v8, 4  ;;  %v158_v12 = vsel %vm143_vm0, %v137_v2, -inf  ;;  %v165_v13 = vsel %vm143_vm0, %v138_v3, -inf }
  0x3c   : > { %v159_v14 = vrot.slane %v158_v12, 4  ;;  %v166_v15 = vrot.slane %v165_v13, 4  ;;  %v172_v16 = vsel %vm143_vm0, %v139_v4, -inf  ;;  %v179_v17 = vsel %vm143_vm0, %v140_v5, -inf  ;;  %s317_s17 = sshll.u32 %s587_s23, 3  ;;  %s319_s28 = sshll.u32 %s504_s10, 7 }
  0x3d   : > { %vm208_vm1 = vcmask 1041409   ;;  %v146_v18 = vmax.f32 %v144_v7, %v145_v10  ;;  %v153_v19 = vmax.f32 %v151_v8, %v152_v11  ;;  %v173_v20 = vrot.slane %v172_v16, 4  ;;  %s134_s25 = scalar_lea.vmem [#allocation5], %s317_s17  ;;  %s613_s3 = scalar_lea.hbm %s656_s1, %s319_s28 }
  0x3e   : > { %v180_v21 = vrot.slane %v179_v17, 4  ;;  %vm210_vm2 = vcmask 1042434   ;;  %v160_v22 = vmax.f32 %v158_v12, %v159_v14  ;;  %v167_v23 = vmax.f32 %v165_v13, %v166_v15  ;;  %s239_s27 = sshll.u32 %s134_s25, 4  ;;  %s226_s10 = scalar_lea.sflag [#allocation4], %s587_s23  ;;  %s608_s27 = int_to_ptr.vmem [resolvable:$true] %s239_s27 }
  0x3f   : > { %v186_v24 = vsel %vm143_vm0, %v141_v6, -inf  ;;  %v193_v25 = vsel %vm143_vm0, %v142_v9, -inf  ;;  %vm212_vm3 = vcmask 1043459   ;;  %v147_v26 = vrot.slane %v146_v18, 2  ;;  %s401_s4 = scalar_lea.vmem %s608_s27, 128  ;;  %p663_p11 = scmp.ne.s32.totalorder %s660_s18, 0 }
  0x40   : > { %v154_v27 = vrot.slane %v153_v19, 2  ;;  %v174_v28 = vmax.f32 %v172_v16, %v173_v20  ;;  %v181_v29 = vmax.f32 %v179_v17, %v180_v21  ;;  %v161_v30 = vrot.slane %v160_v22, 2  ;;  %p402_p6 = scmp.ne.s32.totalorder %s608_s27, %s401_s4  ;;  %s472_s5 = smov [#allocation5]  }
  0x41   : > { %v168_v31 = vrot.slane %v167_v23, 2  ;;  %v187_v32 = vrot.slane %v186_v24, 4  ;;  %v194_v33 = vrot.slane %v193_v25, 4  ;;  %v148_v34 = vmax.f32 %v146_v18, %v147_v26  ;;  %s405_s11 = sshll.u32 %s472_s5, 4  ;;  %s406_s11 = int_to_ptr.vmem [resolvable:$false] %s405_s11 }
  0x42   : > { %v155_v35 = vmax.f32 %v153_v19, %v154_v27  ;;  %v175_v36 = vrot.slane %v174_v28, 2  ;;  %v182_v37 = vrot.slane %v181_v29, 2  ;;  %v162_v38 = vmax.f32 %v160_v22, %v161_v30  ;;  %p403_p12 = pnand %p402_p6, %p663_p11  ;;  %s407_s13 = scalar_lea.vmem %s406_s11, 256 }
  0x43   : > { %v169_v39 = vmax.f32 %v167_v23, %v168_v31  ;;  %v188_v40 = vmax.f32 %v186_v24, %v187_v32  ;;  %v195_v41 = vmax.f32 %v193_v25, %v194_v33  ;;  %v149_v42 = vrot.slane %v148_v34, 1  ;;  %p408_p8 = scmp.lt.s32.totalorder %s608_s27, %s406_s11  ;;  %p409_p10 = scmp.lt.s32.totalorder %s407_s13, %s401_s4 }
  0x44   : > { %v156_v43 = vrot.slane %v155_v35, 1  ;;  %v176_v44 = vmax.f32 %v174_v28, %v175_v36  ;;  %v183_v45 = vmax.f32 %v181_v29, %v182_v37  ;;  %v163_v46 = vrot.slane %v162_v38, 1  ;;  %p404_p13 = pneg %p403_p12 }
  0x45   : > { %v170_v47 = vrot.slane %v169_v39, 1  ;;  %v189_v48 = vrot.slane %v188_v40, 2  ;;  %v196_v49 = vrot.slane %v195_v41, 2  ;;  %v150_v50 = vmax.f32 %v148_v34, %v149_v42  ;;  %p410_p0 = por %p409_p10, %p408_p8 }
  0x46   : > { %v157_v51 = vmax.f32 %v155_v35, %v156_v43  ;;  %v177_v52 = vrot.slane %v176_v44, 1  ;;  %v184_v53 = vrot.slane %v183_v45, 1  ;;  %v164_v54 = vmax.f32 %v162_v38, %v163_v46 }
  0x47   : > { %v171_v55 = vmax.f32 %v169_v39, %v170_v47  ;;  %v190_v56 = vmax.f32 %v188_v40, %v189_v48  ;;  %v197_v57 = vmax.f32 %v195_v41, %v196_v49  ;;  %vm214_vm4 = vcmask 1044484   ;;  %p411_p2 = pnand %p410_p0, %p404_p13 }
  0x48   : > { %v178_v58 = vmax.f32 %v176_v44, %v177_v52  ;;  %v185_v59 = vmax.f32 %v183_v45, %v184_v53  ;;  %v209_v60 = vsel %vm208_vm1, %v157_v51, %v150_v50  ;;  %vm216_vm5 = vcmask 1045509  }
  0x49   : > { %v191_v61 = vrot.slane %v190_v56, 1  ;;  %v198_v62 = vrot.slane %v197_v57, 1  ;;  %v211_v63 = vsel %vm210_vm2, %v164_v54, %v209_v60  ;;  %vm218_vm6 = vcmask 1046534  }
  0x4a   : > { %v213_v0 = vsel %vm212_vm3, %v171_v55, %v211_v63  ;;  %vm220_vm7 = vcmask 1047559   ;;  %vm223_vm8 = vcmask 261120  }
  0x4b   : > { %v192_v1 = vmax.f32 %v190_v56, %v191_v61  ;;  %v199_v2 = vmax.f32 %v197_v57, %v198_v62  ;;  %v215_v3 = vsel %vm214_vm4, %v178_v58, %v213_v0 }
  0x4c   : > { %v217_v4 = vsel %vm216_vm5, %v185_v59, %v215_v3 }
  0x4d   : > { %v219_v5 = vsel %vm218_vm6, %v192_v1, %v217_v4 }
  0x4e   : > { %v221_v6 = vsel %vm220_vm7, %v199_v2, %v219_v5 }
  0x4f   : > { %224 = vst.msk [vmem:[%s134_s25] sm:$0xff] %vm223_vm8, %v221_v6 }
  0x50   : > { %414 = shalt.err (!%p411_p2)
}
  0x51   : > { %s415_s14 = scalar_lea.hbm %s613_s3, 128  ;;  %s419_s21 = scalar_lea.hbm %s656_s1, 256 }
  0x52   : > { %p416_p4 = scmp.ne.s32.totalorder %s613_s3, %s415_s14  ;;  %p420_p9 = scmp.lt.u32.totalorder %s613_s3, %s656_s1 }
  0x53   : > { %p421_p1 = scmp.lt.u32.totalorder %s419_s21, %s415_s14  ;;  %p423_p6 = scmp.lt.u32.totalorder %s415_s14, %s613_s3 }
  0x54   : > { %p417_p5 = pnand %p416_p4, %p663_p11 }
  0x55   : > { %p422_p3 = por %p421_p1, %p420_p9 }
  0x56   : > { %p418_p7 = pneg %p417_p5 }
  0x57   : > { %p424_p12 = por %p423_p6, %p422_p3 }
  0x59   : > { %p425_p13 = pnand %p424_p12, %p418_p7 }
  0x5b   : > { %428 = shalt.err (!%p425_p13)
}
  0x5c   : > { %325 = dma.vmem_to_hbm [thread:$0]  (%p663_p11), %s608_s27, 128, %s613_s3, %s226_s10  }
  0x5d PF: > { %s251_s24 = sand.u32 1, %s455_s6   ;;  %p664_p8 = scmp.ne.s32.totalorder %s661_s19, 0 }
  0x5e   : > { %p665_p10 = scmp.ge.s32.totalorder %s467_s9, 2  ;;  %s252_s26 = scalar_lea.sflag [#allocation4], %s251_s24 }
  0x60   : > { %p332_p0 = pnand %p665_p10, %p664_p8 }
  0x62   : > { %450 = dma.done.wait (!%p332_p0), %s252_s26, 128  }
  0x63   : > { %452 = vsyncadd (!%p332_p0), %s252_s26, 4294967168  ;;  %p14_p2 = scmp.ge.s32.totalorder %s508_s12, 4   ;;  %s666_s6 = smov %s459_s7 }
  0x64   : > { %s667_s7 = smov %s463_s8  ;;  %s668_s8 = smov %s520_s15 }
  0x65   : > { %s669_s9 = smov %s508_s12  ;;  %16 = sbr.rel (!%p14_p2) target bundleno = 5 (0x5), region = 69 }
  0x6c   :  { %257 = vsyncpa [#allocation3], 1 }
  0x6d   :  { %259 = vsyncpa [#allocation3 + $0x1], 1 }
  0x6e   :  { %260 = vsyncpa [#allocation4], 1 }
  0x6f   :  { %262 = vsyncpa [#allocation4 + $0x1], 1 }

</bundles_post_ra>
